<compile_context>
chip_gen: v7x
topology: tpu7x:2x2x1
jax: 0.10.0
libtpu: 0.0.40
codegen_flags: <defaults>
</compile_context>

<pallas_src>
import functools

import jax
import jax.numpy as jnp
import numpy as np
from jax import lax
from jax.experimental import pallas as pl
from jax.experimental.pallas import tpu as pltpu


def _deconv_kernel(x_ref, w_ref, b_ref, o_ref):
    """One grid step: GEMM for one row-tile and one kernel row (kH).

    x_ref: (tm, Cin)             input pixels, tm = rows_per_tile * W
    w_ref: (2, Cin, 2*Cout)      folded weight, VMEM-resident (constant index_map)
    b_ref: (1, 2*Cout)           bias tiled over kW
    o_ref: (tr, 1, W, 2*Cout)    output tile for this (row-tile, kH)
    """
    kh = pl.program_id(1)
    acc = jnp.dot(x_ref[...], w_ref[kh], preferred_element_type=jnp.float32)
    acc = acc + b_ref[...]
    # (tr*W, 2*Cout) -> (tr, 1, W, 2*Cout): W is padded to a multiple of 8 in the
    # wrapper, so this is a sublane-aligned (free) reshape.
    o_ref[...] = acc.reshape(o_ref.shape).astype(o_ref.dtype)


def _pick_rows_per_tile(R, W):
    """Rows (of width W) per tile: ~512 pixels, multiple of 8, >=2 grid steps if possible."""
    tr = max(1, 512 // max(W, 1))
    tr = max(8, (tr // 8) * 8)
    half = (R + 1) // 2
    if half >= 8:
        tr = min(tr, (half // 8) * 8)          # keep >=2 steps on the parallel axis
    tr = min(tr, max(8, ((R + 7) // 8) * 8))   # don't over-pad tiny inputs
    return tr


def conv_transpose_2x2_stride2(x2_nchw, weight, bias, compute_dtype=jnp.float32):
    """ConvTranspose2d(kernel=2, stride=2) -> NHWC output (N, 2H, 2W, Cout).

    weight: (Cin, Cout, 2, 2) (PyTorch layout), bias: (Cout,).
    """
    N, Cin, H, W = x2_nchw.shape
    Cout = weight.shape[1]
    two_c = 2 * Cout

    # NCHW -> NHWC (single pass over the small input); pad width to a multiple of 8
    # so all in-kernel reshapes are sublane aligned (padding is sliced off below).
    x_nhwc = jnp.transpose(x2_nchw, (0, 2, 3, 1))
    Wp = ((W + 7) // 8) * 8
    if Wp != W:
        x_nhwc = jnp.pad(x_nhwc, ((0, 0), (0, 0), (0, Wp - W), (0, 0)))
    A = x_nhwc.reshape(N * H * Wp, Cin).astype(compute_dtype)

    # (Cin, Cout, kH, kW) -> (kH, Cin, kW*Cout): GEMM columns ordered (kW, Cout).
    wf = jnp.transpose(weight, (2, 0, 3, 1)).reshape(2, Cin, two_c).astype(compute_dtype)
    bf = jnp.tile(bias, 2).reshape(1, two_c).astype(jnp.float32)

    R = N * H
    tr = _pick_rows_per_tile(R, Wp)
    Rp = ((R + tr - 1) // tr) * tr
    tm = tr * Wp
    A = jnp.pad(A, ((0, (Rp - R) * Wp), (0, 0)))

    # Explicit VMEM budget (double-buffered x/out tiles + resident weight), clamped
    # so it is valid on v7x's 64 MiB VMEM as well as v5e/v6e.
    in_bytes = jnp.dtype(compute_dtype).itemsize
    est = (2 * tm * Cin * in_bytes
           + 2 * 2 * Cin * two_c * in_bytes
           + 2 * tr * Wp * two_c * 4
           + (2 << 20))
    vmem_limit = int(min(max(est, 32 * 1024 * 1024), 56 * 1024 * 1024))

    out = pl.pallas_call(
        _deconv_kernel,
        out_shape=jax.ShapeDtypeStruct((Rp, 2, Wp, two_c), jnp.float32),
        grid=(Rp // tr, 2),
        in_specs=[
            pl.BlockSpec((tm, Cin), lambda i, kh: (i, 0)),           # constant over kh -> reused
            pl.BlockSpec((2, Cin, two_c), lambda i, kh: (0, 0, 0)),  # whole weight, VMEM-resident
            pl.BlockSpec((1, two_c), lambda i, kh: (0, 0)),
        ],
        out_specs=pl.BlockSpec((tr, 1, Wp, two_c), lambda i, kh: (i, kh, 0, 0)),
        compiler_params=pltpu.CompilerParams(
            dimension_semantics=("parallel", "arbitrary"),
            vmem_limit_bytes=vmem_limit,
        ),
    )(A, wf, bf)

    # (Rp, kH, Wp, kW*Cout) -> (N, H, kH, W, kW, Cout) -> (N, 2H, 2W, Cout): reshapes only.
    y = out[:R].reshape(N, H, 2, Wp, 2, Cout)
    if Wp != W:
        y = y[:, :, :, :W]
    return y.reshape(N, 2 * H, 2 * W, Cout)


def up_forward(x1, x2, weight, bias, compute_dtype=jnp.float32):
    """Equivalent of up.forward(x1, x2) with NCHW tensors (PyTorch contract)."""
    y_nhwc = conv_transpose_2x2_stride2(x2, weight, bias, compute_dtype)
    # Single NHWC->NCHW pass on the upsampled tensor; pad/concat stay in NCHW because
    # the module's external contract is NCHW.
    x2u = jnp.transpose(y_nhwc, (0, 3, 1, 2))
    diffY = x1.shape[2] - x2u.shape[2]
    diffX = x1.shape[3] - x2u.shape[3]
    # F.pad(x2, [dX//2, dX - dX//2, dY//2, dY - dY//2]); lax.pad also handles negative diffs (crop).
    x2p = lax.pad(
        x2u,
        jnp.array(0.0, x2u.dtype),
        [(0, 0, 0), (0, 0, 0),
         (diffY // 2, diffY - diffY // 2, 0),
         (diffX // 2, diffX - diffX // 2, 0)],
    )
    return jnp.concatenate([x2p, x1], axis=1)


if __name__ == "__main__":
    key = jax.random.PRNGKey(0)
    k1, k2, k3, k4 = jax.random.split(key, 4)

    in_ch, out_ch = 8, 4
    N, H2, W2 = 2, 8, 8          # x2 (decoder feature) spatial size
    H1, W1 = 17, 17              # x1 (skip connection) spatial size -> exercises F.pad

    # ConvTranspose2d parameter shapes: weight (in_ch, out_ch, 2, 2), bias (out_ch,)
    bound = 1.0 / np.sqrt(in_ch * 2 * 2)
    weight = jax.random.uniform(k1, (in_ch, out_ch, 2, 2), jnp.float32, -bound, bound)
    bias = jax.random.uniform(k2, (out_ch,), jnp.float32, -bound, bound)

    x1 = jax.random.normal(k3, (N, out_ch, H1, W1), jnp.float32)
    x2 = jax.random.normal(k4, (N, in_ch, H2, W2), jnp.float32)

    up_f32 = jax.jit(up_forward)
    out = jax.block_until_ready(up_f32(x1, x2, weight, bias))
    assert out.shape == (N, 2 * out_ch, H1, W1), out.shape

    # Pure-JAX reference (independent formulation) for a sanity check.
    y_ref = jnp.einsum("nijc,cokl->nikjlo", jnp.transpose(x2, (0, 2, 3, 1)), weight)
    y_ref = y_ref.reshape(N, 2 * H2, 2 * W2, out_ch) + bias
    y_ref = jnp.transpose(y_ref, (0, 3, 1, 2))
    dY, dX = H1 - 2 * H2, W1 - 2 * W2
    y_ref = jnp.pad(y_ref, ((0, 0), (0, 0),
                            (dY // 2, dY - dY // 2),
                            (dX // 2, dX - dX // 2)))
    ref = jnp.concatenate([y_ref, x1], axis=1)
    np.testing.assert_allclose(np.asarray(out), np.asarray(ref), rtol=1e-5, atol=1e-5)

    # bf16-operand MXU path (recommended on v6e/v7x): same kernel, f32 accumulation.
    up_bf16 = jax.jit(functools.partial(up_forward, compute_dtype=jnp.bfloat16))
    out_bf16 = jax.block_until_ready(up_bf16(x1, x2, weight, bias))
    np.testing.assert_allclose(np.asarray(out_bf16), np.asarray(ref), rtol=5e-2, atol=5e-2)

    print("KERNEL_OK")
</pallas_src>

<mosaic_0001>
module attributes {stable_mosaic.version = 11 : i64} {
  func.func @_deconv_kernel(%arg0: i32, %arg1: i32, %arg2: memref<64x8xf32, #tpu.memory_space<vmem>>, %arg3: memref<2x8x8xf32, #tpu.memory_space<vmem>>, %arg4: memref<1x8xf32, #tpu.memory_space<vmem>>, %arg5: memref<8x1x8x8xf32, #tpu.memory_space<vmem>>) attributes {dimension_semantics = [#tpu.dimension_semantics<parallel>, #tpu.dimension_semantics<arbitrary>], iteration_bounds = array<i64: 2, 2>, scalar_prefetch = 0 : i64, scratch_operands = 0 : i64, tpu.core_type = #tpu.core_type<tc>, window_params = [{transform_indices = @transform_0, window_bounds = array<i64: 64, 8>}, {pipeline_mode = #tpu.pipeline_mode<synchronous>, transform_indices = @transform_1, window_bounds = array<i64: 2, 8, 8>}, {pipeline_mode = #tpu.pipeline_mode<synchronous>, transform_indices = @transform_2, window_bounds = array<i64: 1, 8>}, {transform_indices = @transform_3, window_bounds = array<i64: 8, 1, 8, 8>}]} {
    %c0 = arith.constant 0 : index
    %c0_0 = arith.constant 0 : index
    %0 = vector.load %arg2[%c0, %c0_0] : memref<64x8xf32, #tpu.memory_space<vmem>>, vector<64x8xf32>
    %1 = arith.index_cast %arg1 : i32 to index
    %c0_1 = arith.constant 0 : index
    %c0_2 = arith.constant 0 : index
    %2 = vector.load %arg3[%1, %c0_1, %c0_2] : memref<2x8x8xf32, #tpu.memory_space<vmem>>, vector<1x8x8xf32>
    %3 = vector.shape_cast %2 : vector<1x8x8xf32> to vector<8x8xf32>
    %cst = arith.constant dense<0.000000e+00> : vector<64x8xf32>
    %4 = tpu.matmul %0, %3, %cst {dimension_numbers = #tpu.dot_dimension_numbers<[1], [0], [0], [1], [0, 0, 1, 1], [], []>} : vector<64x8xf32>, vector<8x8xf32>, vector<64x8xf32> -> vector<64x8xf32>
    %c0_3 = arith.constant 0 : index
    %c0_4 = arith.constant 0 : index
    %5 = vector.load %arg4[%c0_3, %c0_4] : memref<1x8xf32, #tpu.memory_space<vmem>>, vector<1x8xf32>
    %6 = vector.broadcast %5 : vector<1x8xf32> to vector<64x8xf32>
    %7 = arith.addf %4, %6 : vector<64x8xf32>
    %8 = vector.shape_cast %7 : vector<64x8xf32> to vector<8x1x8x8xf32>
    %c0_5 = arith.constant 0 : index
    %c0_6 = arith.constant 0 : index
    %c0_7 = arith.constant 0 : index
    %c0_8 = arith.constant 0 : index
    %9 = vector.load %arg5[%c0_5, %c0_6, %c0_7, %c0_8] : memref<8x1x8x8xf32, #tpu.memory_space<vmem>>, vector<8x1x8x8xf32>
    tpu.vector_store %arg5[%c0_5, %c0_6, %c0_7, %c0_8], %8 {strides = array<i32>} : memref<8x1x8x8xf32, #tpu.memory_space<vmem>>, vector<8x1x8x8xf32>,
    return
  }
  func.func @transform_0(%arg0: i32, %arg1: i32) -> (i32, i32) {
    %c0_i32 = arith.constant 0 : i32
    %c0_i32_0 = arith.constant 0 : i32
    return %arg0, %c0_i32 : i32, i32
  }
  func.func @transform_1(%arg0: i32, %arg1: i32) -> (i32, i32, i32) {
    %c0_i32 = arith.constant 0 : i32
    %c0_i32_0 = arith.constant 0 : i32
    %c0_i32_1 = arith.constant 0 : i32
    %c0_i32_2 = arith.constant 0 : i32
    return %c0_i32, %c0_i32_0, %c0_i32_1 : i32, i32, i32
  }
  func.func @transform_2(%arg0: i32, %arg1: i32) -> (i32, i32) {
    %c0_i32 = arith.constant 0 : i32
    %c0_i32_0 = arith.constant 0 : i32
    %c0_i32_1 = arith.constant 0 : i32
    return %c0_i32, %c0_i32_0 : i32, i32
  }
  func.func @transform_3(%arg0: i32, %arg1: i32) -> (i32, i32, i32, i32) {
    %c0_i32 = arith.constant 0 : i32
    %c0_i32_0 = arith.constant 0 : i32
    %c0_i32_1 = arith.constant 0 : i32
    return %arg0, %arg1, %c0_i32, %c0_i32_0 : i32, i32, i32, i32
  }
}

</mosaic_0001>

<bundles_post_ra>
// kernel: tile.9
= control target key start
LH: loop header
LB: loop body
LE: loop exit
PB: predicated region body
PF: predicated region fallthrough
CT: control target
= control target key end

     0   :  { %vm7_vm0 = vcmask 31744   ;;  %vm13_vm1 = vcmask 64544   ;;  %s39_s0 = inlined_call_operand.vmem [shape: f32[2,4], index: 0, kind: input, shape index: {}]   ;;  %s40_s1 = inlined_call_operand.vmem [shape: f32[1,8], index: 1, kind: output, shape index: {}]  }
   0x1   :  { %v4_v0 = vld [vmem:[%s39_s0] sm:$0x3]  ;;  %s22_s0 = smov 4  }
   0x2   :  { %5 = vst [vmem:[#allocation1] sm:$0x3] %v4_v0 }
   0x9   :  { %v10_v1 = vld [vmem:[#allocation1 + $0x1] sm:$0x1]   ;;  %v6_v2 = vld [vmem:[#allocation1] sm:$0x1]  }
   0xa   :  { %11 = vrot.lane.b32.xlu0 %v10_v1, %s22_s0  ;;  %8 = vst.msk [vmem:[#allocation0] sm:$0x1] %vm7_vm0, %v6_v2  }
  0x7c   :  { %v12_v3 = vpop.permute.xlu0 %11  }
  0x7d   :  { %14 = vst.msk [vmem:[#allocation0] sm:$0x1] %vm13_vm1, %v12_v3  }
  0x84   :  { %v18_v4 = vld [vmem:[#allocation0] sm:$0x1] }
  0x85   :  { %20 = vst [vmem:[%s40_s1] sm:$0x1] %v18_v4 }

// kernel: tile.8
= control target key start
LH: loop header
LB: loop body
LE: loop exit
PB: predicated region body
PF: predicated region fallthrough
CT: control target
= control target key end

     0   :  { %s22_s0 = inlined_call_operand.vmem [shape: f32[4], index: 0, kind: input, shape index: {}]   ;;  %s23_s1 = inlined_call_operand.vmem [shape: f32[2,4], index: 1, kind: output, shape index: {}]  }
   0x1   :  { %v4_v0 = vld [vmem:[%s22_s0] ss:$0 sm:$0xff] }
   0x2   :  { %5 = vst [vmem:[%s23_s1] sm:$0x3] %v4_v0 }

// kernel: up_forward.1
= control target key start
LH: loop header
LB: loop body
LE: loop exit
PB: predicated region body
PF: predicated region fallthrough
CT: control target
= control target key end

     0   :  { %s658_s12 = smov 0   ;;  %s660_s13 = smov 0   ;;  %s773_s0 = inlined_call_operand.vmem [shape: f32[128,8], index: 0, kind: input, shape index: {}]   ;;  %s774_s1 = inlined_call_operand.vmem [shape: f32[2,8,8], index: 1, kind: input, shape index: {}]   ;;  %s775_s2 = inlined_call_operand.vmem [shape: f32[1,8], index: 2, kind: input, shape index: {}]   ;;  %s776_s3 = inlined_call_operand.vmem [shape: f32[16,2,8,8], index: 3, kind: output, shape index: {}]  }
   0x1   :  { %s662_s14 = smov 0   ;;  %s664_s15 = smov 0  }
   0x2   :  { %s666_s16 = smov 0   ;;  %s668_s17 = smov 0  }
   0x3   :  { %s670_s18 = smov 0  }
   0x4 LB: > { %s22_s19 = sadd.s32 1, %s628_s16  ;;  %s25_s20 = sadd.s32 1, %s632_s17  ;;  %s636_s18 = sphi %s670_s18, %s13_s18   ;;  %s632_s17 = sphi %s668_s17, %s783_s17   ;;  %s628_s16 = sphi %s666_s16, %s782_s16   ;;  %s624_s15 = sphi %s664_s15, %s781_s15   ;;  %s620_s14 = sphi %s662_s14, %s780_s14   ;;  %s616_s13 = sphi %s660_s13, %s779_s13   ;;  %s612_s12 = sphi %s658_s12, %s778_s12  }
   0x5   : > { %p23_p0 = scmp.ge.s32.totalorder %s22_s19, 2  ;;  %s476_s21 = sadd.s32 4294967295, %s636_s18  }
   0x6   : > { %p112_p1 = scmp.ne.s32.totalorder %s616_s13, %s612_s12  ;;  %p113_p2 = scmp.eq.s32.totalorder %s476_s21, 3 }
   0x7   : > { %s785_s19 = smov (%p23_p0, %s22_s19), 0  ;;  %s787_s20 = smov (!%p23_p0, %s25_s20), %s632_s17 }
   0x8   : > { %s98_s22 = ssub.s32 %s628_s16, %s785_s19  ;;  %p27_p3 = scmp.ge.s32.totalorder %s787_s20, 2 }
   0x9   : > { %p480_p4 = scmp.ge.s32.totalorder %s636_s18, 1  ;;  %p704_p5 = por %p113_p2, %p112_p1 }
   0xa   : > { %p152_p6 = scmp.lt.s32.totalorder %s636_s18, 5  ;;  %s789_s20 = smov (%p27_p3, %s787_s20), 0 }
   0xb   : > { %s97_s24 = ssub.s32 %s632_s17, %s789_s20  ;;  %s102_s26 = sadd.s32 1, %s616_s13 }
   0xc   : > { %p153_p7 = pnand %p480_p4, %p152_p6  ;;  %s99_s25 = sor.u32 %s98_s22, %s97_s24 }
   0xd   : > { %p100_p8 = scmp.eq.s32.totalorder %s99_s25, 0  ;;  %s484_s28 = sshll.u32 (!%p153_p7), %s620_s14, 3  ;;  %vm200_vm0 = vcmask (!%p153_p7), 64512   ;;  %v485_v9 = vld [vmem:[%s775_s2] ss:$0 sm:$0xff] (!%p153_p7) }
   0xe   : > { %156 = sbr.rel (%p153_p7) target bundleno = 255 (0xff), region = 32  ;;  %s482_s29 = sshll.u32 (!%p153_p7), %s624_s15, 3 }
   0xf   : > { %s715_s27 = scalar_select %p100_p8, %s616_s13, %s102_s26  }
  0x10   : > { %s191_s5 = scalar_lea.vmem (!%p153_p7), %s774_s1, %s484_s28  ;;  %p176_p9 = scmp.lt.s32.totalorder (!%p153_p7), %s482_s29, 15 }
  0x11   : > { %v192_v0 = vld [vmem:[%s191_s5] sm:$0xff] (!%p153_p7)  ;;  %s172_s10 = sand.u32 (!%p153_p7), 1, %s612_s12  }
  0x12   : > { %510 = vmatprep.subr.mxu0 (!%p153_p7), %v192_v0  ;;  %524 = vmatprep.subr.mxu1 (!%p153_p7), %v192_v0  ;;  %s481_s11 = sshll.u32 (!%p153_p7), %s172_s10, 6 }
  0x13   : > { %511 = vmatpush3.msra.mxu0 (!%p153_p7), %v192_v0  ;;  %525 = vmatpush3.msra.mxu1 (!%p153_p7), %v192_v0  ;;  %s174_s24 = scalar_lea.vmem (!%p153_p7), [#allocation2], %s481_s11 }
  0x15   : > { %s791_s29 = smov (!%p176_p9, %s482_s29), 15  ;;  %s500_s12 = sshll.u32 (%p704_p5), %s624_s15, 4 }
  0x16   : > { %s483_s6 = sshll.u32 %s791_s29, 3  ;;  %s347_s25 = sadd.s32 (%p704_p5), %s620_s14, %s500_s12 }
  0x17   : > { %s179_s9 = scalar_lea.vmem %s773_s0, %s483_s6  ;;  %s497_s26 = sshll.u32 (%p704_p5), %s347_s25, 3 }
  0x18   : > { %v182_v1 = vld [vmem:[%s179_s9] sm:$0xff]  ;;  %v183_v3 = vld [vmem:[%s179_s9 + $0x8] sm:$0xff]  ;;  %v184_v5 = vld [vmem:[%s179_s9 + $0x10] sm:$0xff]  ;;  %s349_s30 = scalar_lea.vmem (%p704_p5), %s776_s3, %s497_s26 }
  0x19   : > { %v186_v2 = vld [vmem:[%s179_s9 + $0x20] sm:$0xff]  ;;  %512 = vmatprep.mubr.msk.f32.mxu0 %vm200_vm0, %v182_v1  ;;  %v187_v4 = vld [vmem:[%s179_s9 + $0x28] sm:$0xff]  ;;  %v188_v6 = vld [vmem:[%s179_s9 + $0x30] sm:$0xff] }
  0x1a   : > { %518 = vmatprep.mubr.msk.f32.mxu1 %vm200_vm0, %v186_v2  ;;  %513 = vmatmul.mubr.msk.f32.vlgmr.msra.gmra.mrb[0].mxu0 %vm200_vm0, %v183_v3  ;;  %v185_v7 = vld [vmem:[%s179_s9 + $0x18] sm:$0xff] }
  0x1b   : > { %519 = vmatmul.mubr.msk.f32.vlgmr.msra.gmra.mrb[0].mxu1 %vm200_vm0, %v187_v4  ;;  %515 = vmatprep.mubr.msk.f32.mxu0 %vm200_vm0, %v184_v5  ;;  %v189_v8 = vld [vmem:[%s179_s9 + $0x38] sm:$0xff] }
  0x1c   : > { %521 = vmatprep.mubr.msk.f32.mxu1 %vm200_vm0, %v188_v6 }
  0x1e   : > { %516 = vmatmul.mubr.msk.f32.gmra.mrb[2].mxu0 %vm200_vm0, %v185_v7 }
  0x1f   : > { %522 = vmatmul.mubr.msk.f32.gmra.mrb[2].mxu1 %vm200_vm0, %v189_v8 }
  0xed   : > { %v514_v10 = vpop.f32.mrb[0].mxu0 }
  0xee   : > { %v520_v11 = vpop.f32.mrb[0].mxu1  ;;  %v297_v12 = vadd.f32 %v514_v10, %v485_v9  ;;  %v291_v14 = vpop.f32.mrb[1].mxu0 }
  0xef   : > { %v317_v13 = vadd.f32 %v520_v11, %v485_v9  ;;  %v311_v15 = vpop.f32.mrb[1].mxu1  ;;  %v292_v16 = vadd.f32 %v485_v9, %v291_v14 }
  0xf0   : > { %v312_v17 = vadd.f32 %v485_v9, %v311_v15  ;;  %331 = vst.msk [vmem:[%s174_s24 + $0x8] sm:$0xff] %vm200_vm0, %v297_v12  ;;  %344 = sbr.rel (!%p704_p5) target bundleno = 255 (0xff), region = 36 }
  0xf1   : > { %335 = vst.msk [vmem:[%s174_s24 + $0x28] sm:$0xff] %vm200_vm0, %v317_v13  ;;  %330 = vst.msk [vmem:[%s174_s24] sm:$0xff] %vm200_vm0, %v292_v16  ;;  %v517_v18 = vpop.f32.mrb[2].mxu0 }
  0xf2   : > { %334 = vst.msk [vmem:[%s174_s24 + $0x20] sm:$0xff] %vm200_vm0, %v312_v17  ;;  %v523_v19 = vpop.f32.mrb[2].mxu1  ;;  %v307_v20 = vadd.f32 %v517_v18, %v485_v9  ;;  %v301_v22 = vpop.f32.mrb[3].mxu0 }
  0xf3   : > { %v327_v21 = vadd.f32 %v523_v19, %v485_v9  ;;  %v321_v23 = vpop.f32.mrb[3].mxu1  ;;  %v302_v24 = vadd.f32 %v485_v9, %v301_v22 }
  0xf4   : > { %v322_v25 = vadd.f32 %v485_v9, %v321_v23  ;;  %333 = vst.msk [vmem:[%s174_s24 + $0x18] sm:$0xff] %vm200_vm0, %v307_v20 }
  0xf5   : > { %337 = vst.msk [vmem:[%s174_s24 + $0x38] sm:$0xff] %vm200_vm0, %v327_v21  ;;  %332 = vst.msk [vmem:[%s174_s24 + $0x10] sm:$0xff] %vm200_vm0, %v302_v24 }
  0xf6   : > { %336 = vst.msk [vmem:[%s174_s24 + $0x30] sm:$0xff] %vm200_vm0, %v322_v25 }
  0xf7   : > { %v393_v27 = vld [vmem:[%s174_s24 + $0x8] sm:$0xff] }
  0xf8   : > { %v391_v26 = vld [vmem:[%s174_s24] sm:$0xff]  ;;  %v401_v31 = vld [vmem:[%s174_s24 + $0x28] sm:$0xff]  ;;  %394 = vst [vmem:[%s349_s30 + $0x10] sm:$0xff] %v393_v27 }
  0xf9   : > { %v399_v30 = vld [vmem:[%s174_s24 + $0x20] sm:$0xff]  ;;  %392 = vst [vmem:[%s349_s30] sm:$0xff] %v391_v26  ;;  %402 = vst [vmem:[%s349_s30 + $0x50] sm:$0xff] %v401_v31 }
  0xfa   : > { %400 = vst [vmem:[%s349_s30 + $0x40] sm:$0xff] %v399_v30 }
  0xfb   : > { %v397_v29 = vld [vmem:[%s174_s24 + $0x18] sm:$0xff] }
  0xfc   : > { %v395_v28 = vld [vmem:[%s174_s24 + $0x10] sm:$0xff]  ;;  %v405_v33 = vld [vmem:[%s174_s24 + $0x38] sm:$0xff]  ;;  %398 = vst [vmem:[%s349_s30 + $0x30] sm:$0xff] %v397_v29 }
  0xfd   : > { %v403_v32 = vld [vmem:[%s174_s24 + $0x30] sm:$0xff]  ;;  %396 = vst [vmem:[%s349_s30 + $0x20] sm:$0xff] %v395_v28  ;;  %406 = vst [vmem:[%s349_s30 + $0x70] sm:$0xff] %v405_v33 }
  0xfe   : > { %404 = vst [vmem:[%s349_s30 + $0x60] sm:$0xff] %v403_v32 }
  0xff PF: > { %s13_s18 = sadd.s32 1, %s636_s18   ;;  %s778_s12 = smov %s616_s13 }
 0x100   : > { %p10_p10 = scmp.ge.s32.totalorder %s13_s18, 6   ;;  %s779_s13 = smov %s715_s27 }
 0x101   : > { %s780_s14 = smov %s628_s16  ;;  %s781_s15 = smov %s632_s17 }
 0x102   : > { %s782_s16 = smov %s785_s19  ;;  %s783_s17 = smov %s789_s20 }
 0x103   :  { %12 = sbr.rel (!%p10_p10) target bundleno = 4 (0x4), region = 101 }

</bundles_post_ra>
